<compile_context>
chip_gen: v7x
topology: tpu7x:2x2x1
jax: 0.10.0
libtpu: 0.0.40
codegen_flags: <defaults>
</compile_context>

<pallas_src>
import functools

import jax
import jax.numpy as jnp
from jax import lax
from jax.experimental import pallas as pl
from jax.experimental.pallas import tpu as pltpu


# --------------------------- tiling helpers ------------------------------------

_VMEM_LIMIT_BYTES = 48 * 1024 * 1024    # explicit scoped-VMEM limit; safe on v5e/v6e/v7x
_BLOCK_BYTES_BUDGET = 4 * 1024 * 1024   # ~4 MiB per (rows, C) block -> ~16 MiB double-buffered
_MAX_ROW_TILE = 1024


def _round_up(a, b):
    return (a + b - 1) // b * b


def _pick_row_tile(n, c, itemsize):
    """Largest VMEM-friendly row tile (multiple of 8)."""
    tr = _BLOCK_BYTES_BUDGET // max(1, c * itemsize)
    tr = max(8, min(tr, _MAX_ROW_TILE))
    tr = (tr // 8) * 8
    if tr >= n:                      # small input: single (padded) block
        tr = _round_up(n, 8)
    return tr


def _pick_chan_tile(c):
    """Channel tile for the stats pass: full C unless C is a multiple of 128,
    in which case split it so the stats grid gets a 'parallel' axis
    (megacore sharding on v7x)."""
    if c % 128 != 0:
        return c
    for tc in (256, 128):
        if c > tc and c % tc == 0:
            return tc
    return c


def _pad_rows(x2d, npad):
    n = x2d.shape[0]
    if npad == n:
        return x2d
    return jnp.pad(x2d, ((0, npad - n), (0, 0)))


# ----------------------- row-wise kernels (reduce over C) -----------------------

def _layernorm_kernel(x_ref, w_ref, b_ref, o_ref, *, eps):
    x = x_ref[...].astype(jnp.float32)                    # (TR, C)
    mean = jnp.mean(x, axis=-1, keepdims=True)
    xc = x - mean
    var = jnp.mean(xc * xc, axis=-1, keepdims=True)       # biased (torch LayerNorm)
    o_ref[...] = (xc * lax.rsqrt(var + eps) * w_ref[...] + b_ref[...]).astype(o_ref.dtype)


def _rmsnorm_kernel(x_ref, w_ref, o_ref, *, eps, num_features):
    x = x_ref[...].astype(jnp.float32)                    # (TR, C)
    norm = jnp.sqrt(jnp.sum(x * x, axis=-1, keepdims=True))
    rms = norm * (float(num_features) ** -0.5)
    inv = 1.0 / (rms + eps)                               # single divide, reused
    o_ref[...] = (w_ref[...] * (x * inv)).astype(o_ref.dtype)


def _adanorm_kernel(x_ref, o_ref, *, eps, scale, num_features):
    x = x_ref[...].astype(jnp.float32)                    # (TR, C)
    mean = jnp.mean(x, axis=-1, keepdims=True)
    xc = x - mean
    # torch .std() is unbiased (divide by C - 1)
    std = jnp.sqrt(jnp.sum(xc * xc, axis=-1, keepdims=True) * (1.0 / (num_features - 1)))
    inv = 1.0 / (std + eps)                               # one divide shared by gra & scale
    gra = 0.1 * xc * inv
    o_ref[...] = (xc * (1.0 - gra) * inv * scale).astype(o_ref.dtype)


def _affine_kernel(x_ref, scale_ref, shift_ref, o_ref):
    x = x_ref[...].astype(jnp.float32)                    # (TR, C)
    o_ref[...] = (x * scale_ref[...] + shift_ref[...]).astype(o_ref.dtype)


def _rowwise_pallas(kernel, x2d, params, out_dtype=None):
    """Run a row-wise kernel over [N, C] with large row tiles (pads N if needed)."""
    n, c = x2d.shape
    tr = _pick_row_tile(n, c, jnp.dtype(x2d.dtype).itemsize)
    npad = _round_up(n, tr)
    xp = _pad_rows(x2d, npad)
    in_specs = [pl.BlockSpec((tr, c), lambda i: (i, 0))]
    in_specs += [pl.BlockSpec((1, c), lambda i: (0, 0)) for _ in params]
    out = pl.pallas_call(
        kernel,
        out_shape=jax.ShapeDtypeStruct((npad, c), out_dtype or x2d.dtype),
        grid=(npad // tr,),
        in_specs=in_specs,
        out_specs=pl.BlockSpec((tr, c), lambda i: (i, 0)),
        compiler_params=pltpu.CompilerParams(
            dimension_semantics=("parallel",),
            vmem_limit_bytes=_VMEM_LIMIT_BYTES),
    )(xp, *params)
    return out if npad == n else out[:n]


# ----------------- batch-norm stats kernels (reduce over rows) ------------------

def _bn_stats_kernel(x_ref, s1_ref, s2_ref):
    @pl.when(pl.program_id(1) == 0)
    def _():
        s1_ref[...] = jnp.zeros_like(s1_ref)
        s2_ref[...] = jnp.zeros_like(s2_ref)
    x = x_ref[...].astype(jnp.float32)                    # (TR, TC)
    s1_ref[...] += jnp.sum(x, axis=0, keepdims=True)
    s2_ref[...] += jnp.sum(x * x, axis=0, keepdims=True)


def _bn_masked_stats_kernel(x_ref, m_ref, s1_ref, s2_ref):
    @pl.when(pl.program_id(1) == 0)
    def _():
        s1_ref[...] = jnp.zeros_like(s1_ref)
        s2_ref[...] = jnp.zeros_like(s2_ref)
    x = x_ref[...].astype(jnp.float32)                    # (TR, TC)
    m = m_ref[...].astype(jnp.float32)                    # (TR, 1); 1.0 = valid row
    xm = x * m
    s1_ref[...] += jnp.sum(xm, axis=0, keepdims=True)
    s2_ref[...] += jnp.sum(xm * x, axis=0, keepdims=True)  # m is {0,1} so m*m == m


def _bn_stats(x2d, include_rows=None):
    """Per-channel (1, C) f32 sum and sum-of-squares over rows (optionally masked)."""
    n, c = x2d.shape
    tr = _pick_row_tile(n, c, jnp.dtype(x2d.dtype).itemsize)
    npad = _round_up(n, tr)
    xp = _pad_rows(x2d, npad)
    tc = _pick_chan_tile(c)
    grid = (c // tc, npad // tr)                          # (parallel C, arbitrary rows)
    if include_rows is None:
        kernel = _bn_stats_kernel
        in_specs = [pl.BlockSpec((tr, tc), lambda ci, ri: (ri, ci))]
        args = (xp,)
    else:
        kernel = _bn_masked_stats_kernel
        mp = _pad_rows(include_rows.reshape(-1, 1).astype(jnp.float32), npad)
        in_specs = [pl.BlockSpec((tr, tc), lambda ci, ri: (ri, ci)),
                    pl.BlockSpec((tr, 1), lambda ci, ri: (ri, 0))]
        args = (xp, mp)
    s1, s2 = pl.pallas_call(
        kernel,
        out_shape=(jax.ShapeDtypeStruct((1, c), jnp.float32),
                   jax.ShapeDtypeStruct((1, c), jnp.float32)),
        grid=grid,
        in_specs=in_specs,
        out_specs=(pl.BlockSpec((1, tc), lambda ci, ri: (0, ci)),
                   pl.BlockSpec((1, tc), lambda ci, ri: (0, ci))),
        compiler_params=pltpu.CompilerParams(
            dimension_semantics=("parallel", "arbitrary"),
            vmem_limit_bytes=_VMEM_LIMIT_BYTES),
    )(*args)
    return s1, s2


# ---------------------------------- NormLayer -----------------------------------

class NormLayerPallas:
    """JAX/Pallas port of NormLayer (forward semantics, training-mode stats)."""

    def __init__(self, norm_type, num_features, adanorm_scale=1.0):
        self.norm_type = norm_type
        self.num_features = num_features
        self.adanorm_scale = float(adanorm_scale)
        c = num_features
        # Deterministic, non-trivial parameter init (synthetic weights).
        if norm_type in ("layernorm", "batchnorm", "maskedbatchnorm"):
            self.weight = 1.0 + 0.05 * jnp.arange(c, dtype=jnp.float32)
            self.bias = 0.02 * jnp.arange(c, dtype=jnp.float32)
        elif norm_type == "rmsnorm":
            self.scale = 1.0 + 0.05 * jnp.arange(c, dtype=jnp.float32)
        elif norm_type in ("adanorm", "identity"):
            pass
        else:
            raise NotImplementedError(norm_type)
        # TODO(synk): running_mean / running_var buffer updates (stateful side
        # effect) and eval-mode running-stat normalization are not implemented;
        # batch-norm variants use training-mode (batch) statistics.

    def __call__(self, x, mask=None):
        nt = self.norm_type
        c = self.num_features
        if nt == "identity":
            return x

        if nt in ("layernorm", "rmsnorm", "adanorm"):
            orig_shape = x.shape
            x2d = x.reshape(-1, c)
            if nt == "layernorm":
                out = _rowwise_pallas(
                    functools.partial(_layernorm_kernel, eps=1e-5),
                    x2d, [self.weight.reshape(1, c), self.bias.reshape(1, c)])
            elif nt == "rmsnorm":
                out = _rowwise_pallas(
                    functools.partial(_rmsnorm_kernel, eps=1e-8, num_features=c),
                    x2d, [self.scale.reshape(1, c)])
            else:  # adanorm
                out = _rowwise_pallas(
                    functools.partial(_adanorm_kernel, eps=1e-5,
                                      scale=self.adanorm_scale, num_features=c),
                    x2d, [])
            return out.reshape(orig_shape)

        if nt == "batchnorm":
            eps = 1e-5
            orig_shape = x.shape
            x2d = x.reshape(-1, c)            # [B*T, C] or [B, C]
            n_valid = x2d.shape[0]
            s1, s2 = _bn_stats(x2d)
            mean = s1 / n_valid
            var = s2 / n_valid - mean * mean  # biased (training-mode BN)
            scale = self.weight.reshape(1, c) * lax.rsqrt(var + eps)
            shift = self.bias.reshape(1, c) - mean * scale
            out = _rowwise_pallas(_affine_kernel, x2d, [scale, shift])
            return out.reshape(orig_shape)

        if nt == "maskedbatchnorm":
            assert x.ndim == 3 and mask is not None
            eps = 1e-5
            orig_shape = x.shape
            # torch forward does `mask = ~mask.bool()`: input mask marks padded
            # positions; the inverted mask marks valid positions.
            include = jnp.logical_not(mask.astype(bool)).astype(jnp.float32)  # (B, T)
            x2d = x.reshape(-1, c)
            num = jnp.sum(include)
            s1, s2 = _bn_stats(x2d, include_rows=include.reshape(-1))
            mean = s1 / (num + eps)
            # sum over valid rows of (x - mean)^2 == S2 - 2*mean*S1 + num*mean^2
            var = (s2 - 2.0 * mean * s1 + num * mean * mean) / (num + eps)
            scale = self.weight.reshape(1, c) * lax.rsqrt(var + eps)
            shift = self.bias.reshape(1, c) - mean * scale
            out = _rowwise_pallas(_affine_kernel, x2d, [scale, shift])
            return out.reshape(orig_shape)

        raise NotImplementedError(nt)


# -------------------------- pure-JAX reference checks ---------------------------

def _reference(nt, layer, x, mask):
    c = layer.num_features
    if nt == "identity":
        return x
    if nt == "layernorm":
        mean = x.mean(-1, keepdims=True)
        var = ((x - mean) ** 2).mean(-1, keepdims=True)
        return (x - mean) / jnp.sqrt(var + 1e-5) * layer.weight + layer.bias
    if nt == "rmsnorm":
        norm = jnp.sqrt(jnp.sum(x * x, axis=-1, keepdims=True))
        rms = norm * (c ** -0.5)
        return layer.scale * (x / (rms + 1e-8))
    if nt == "adanorm":
        mean = x.mean(-1, keepdims=True)
        std = jnp.std(x, axis=-1, keepdims=True, ddof=1)
        xc = x - mean
        gra = 0.1 * xc / (std + 1e-5)
        return (xc - xc * gra) / (std + 1e-5) * layer.adanorm_scale
    if nt == "batchnorm":
        axes = (0, 1) if x.ndim == 3 else (0,)
        mean = x.mean(axis=axes, keepdims=True)
        var = ((x - mean) ** 2).mean(axis=axes, keepdims=True)
        return (x - mean) / jnp.sqrt(var + 1e-5) * layer.weight + layer.bias
    if nt == "maskedbatchnorm":
        inc = (1.0 - mask.astype(jnp.float32))[:, :, None]
        num = inc.sum()
        mean = (x * inc).sum(axis=(0, 1), keepdims=True) / (num + 1e-5)
        xcm = (x - mean) * inc
        var = (xcm * xcm).sum(axis=(0, 1), keepdims=True) / (num + 1e-5)
        return (x - mean) / jnp.sqrt(var + 1e-5) * layer.weight + layer.bias
    raise NotImplementedError(nt)


if __name__ == "__main__":
    key = jax.random.PRNGKey(0)
    norm_types = ["layernorm", "rmsnorm", "adanorm", "batchnorm",
                  "maskedbatchnorm", "identity"]

    # (B, T, C) configs: small C (32, not lane-aligned) and 128-aligned C with
    # B*T not a multiple of the tile (exercises padding + parallel channel split).
    for (B, T, C) in [(2, 8, 32), (3, 24, 256)]:
        kx = jax.random.fold_in(key, C)
        x = jax.random.normal(kx, (B, T, C), dtype=jnp.float32)
        valid_len = T // 2 + jnp.arange(B)
        # mask[b, t] = 1.0 marks a padded position (inverted inside, per torch code).
        mask = (jnp.arange(T)[None, :] >= valid_len[:, None]).astype(jnp.float32)

        for nt in norm_types:
            layer = NormLayerPallas(nt, C, adanorm_scale=2.0)
            out = layer(x, mask=mask if nt == "maskedbatchnorm" else None)
            out = jax.block_until_ready(out)
            ref = _reference(nt, layer, x, mask)
            assert out.shape == x.shape and out.dtype == x.dtype, nt
            assert jnp.allclose(out, ref, atol=5e-4, rtol=5e-4), f"mismatch for {nt} C={C}"

    # 2-D batchnorm input path ([B, C]).
    x2 = jax.random.normal(jax.random.fold_in(key, 7), (6, 32), dtype=jnp.float32)
    layer2 = NormLayerPallas("batchnorm", 32)
    out2 = jax.block_until_ready(layer2(x2))
    ref2 = _reference("batchnorm", layer2, x2, None)
    assert out2.shape == x2.shape
    assert jnp.allclose(out2, ref2, atol=5e-4, rtol=5e-4), "mismatch for batchnorm 2D"

    # bf16 input (f32 internal math, bf16 store).
    xb = jax.random.normal(jax.random.fold_in(key, 11), (2, 8, 32)).astype(jnp.bfloat16)
    layer_b = NormLayerPallas("layernorm", 32)
    out_b = jax.block_until_ready(layer_b(xb))
    ref_b = _reference("layernorm", layer_b, xb.astype(jnp.float32), None)
    assert out_b.dtype == jnp.bfloat16
    assert jnp.allclose(out_b.astype(jnp.float32), ref_b, atol=5e-2, rtol=5e-2), \
        "mismatch for layernorm bf16"

    print("KERNEL_OK")
</pallas_src>

<mosaic_0001>
module attributes {stable_mosaic.version = 11 : i64} {
  func.func @_layernorm_kernel(%arg0: i32, %arg1: memref<16x32xf32, #tpu.memory_space<vmem>>, %arg2: memref<1x32xf32, #tpu.memory_space<vmem>>, %arg3: memref<1x32xf32, #tpu.memory_space<vmem>>, %arg4: memref<16x32xf32, #tpu.memory_space<vmem>>) attributes {dimension_semantics = [#tpu.dimension_semantics<parallel>], iteration_bounds = array<i64: 1>, scalar_prefetch = 0 : i64, scratch_operands = 0 : i64, tpu.core_type = #tpu.core_type<tc>, window_params = [{transform_indices = @transform_0, window_bounds = array<i64: 16, 32>}, {pipeline_mode = #tpu.pipeline_mode<synchronous>, transform_indices = @transform_1, window_bounds = array<i64: 1, 32>}, {pipeline_mode = #tpu.pipeline_mode<synchronous>, transform_indices = @transform_2, window_bounds = array<i64: 1, 32>}, {transform_indices = @transform_3, window_bounds = array<i64: 16, 32>}]} {
    %c0 = arith.constant 0 : index
    %c0_0 = arith.constant 0 : index
    %0 = vector.load %arg1[%c0, %c0_0] : memref<16x32xf32, #tpu.memory_space<vmem>>, vector<16x32xf32>
    %cst = arith.constant dense<0.000000e+00> : vector<16xf32>
    %1 = vector.multi_reduction <add>, %0, %cst [1] : vector<16x32xf32> to vector<16xf32>
    %2 = vector.shape_cast %1 : vector<16xf32> to vector<16x1xf32>
    %cst_1 = arith.constant 3.200000e+01 : f32
    %3 = vector.broadcast %cst_1 : f32 to vector<16x1xf32>
    %4 = arith.divf %2, %3 : vector<16x1xf32>
    %5 = vector.broadcast %4 : vector<16x1xf32> to vector<16x32xf32>
    %6 = arith.subf %0, %5 : vector<16x32xf32>
    %7 = arith.mulf %6, %6 : vector<16x32xf32>
    %cst_2 = arith.constant dense<0.000000e+00> : vector<16xf32>
    %8 = vector.multi_reduction <add>, %7, %cst_2 [1] : vector<16x32xf32> to vector<16xf32>
    %9 = vector.shape_cast %8 : vector<16xf32> to vector<16x1xf32>
    %cst_3 = arith.constant 3.200000e+01 : f32
    %10 = vector.broadcast %cst_3 : f32 to vector<16x1xf32>
    %11 = arith.divf %9, %10 : vector<16x1xf32>
    %cst_4 = arith.constant 9.99999974E-6 : f32
    %12 = vector.broadcast %cst_4 : f32 to vector<16x1xf32>
    %13 = arith.addf %11, %12 : vector<16x1xf32>
    %14 = math.rsqrt %13 : vector<16x1xf32>
    %15 = vector.broadcast %14 : vector<16x1xf32> to vector<16x32xf32>
    %16 = arith.mulf %6, %15 : vector<16x32xf32>
    %c0_5 = arith.constant 0 : index
    %c0_6 = arith.constant 0 : index
    %17 = vector.load %arg2[%c0_5, %c0_6] : memref<1x32xf32, #tpu.memory_space<vmem>>, vector<1x32xf32>
    %18 = vector.broadcast %17 : vector<1x32xf32> to vector<16x32xf32>
    %19 = arith.mulf %16, %18 : vector<16x32xf32>
    %c0_7 = arith.constant 0 : index
    %c0_8 = arith.constant 0 : index
    %20 = vector.load %arg3[%c0_7, %c0_8] : memref<1x32xf32, #tpu.memory_space<vmem>>, vector<1x32xf32>
    %21 = vector.broadcast %20 : vector<1x32xf32> to vector<16x32xf32>
    %22 = arith.addf %19, %21 : vector<16x32xf32>
    %c0_9 = arith.constant 0 : index
    %c0_10 = arith.constant 0 : index
    %23 = vector.load %arg4[%c0_9, %c0_10] : memref<16x32xf32, #tpu.memory_space<vmem>>, vector<16x32xf32>
    tpu.vector_store %arg4[%c0_9, %c0_10], %22 {strides = array<i32>} : memref<16x32xf32, #tpu.memory_space<vmem>>, vector<16x32xf32>,
    return
  }
  func.func @transform_0(%arg0: i32) -> (i32, i32) {
    %c0_i32 = arith.constant 0 : i32
    %c0_i32_0 = arith.constant 0 : i32
    return %arg0, %c0_i32 : i32, i32
  }
  func.func @transform_1(%arg0: i32) -> (i32, i32) {
    %c0_i32 = arith.constant 0 : i32
    %c0_i32_0 = arith.constant 0 : i32
    %c0_i32_1 = arith.constant 0 : i32
    return %c0_i32, %c0_i32_0 : i32, i32
  }
  func.func @transform_2(%arg0: i32) -> (i32, i32) {
    %c0_i32 = arith.constant 0 : i32
    %c0_i32_0 = arith.constant 0 : i32
    %c0_i32_1 = arith.constant 0 : i32
    return %c0_i32, %c0_i32_0 : i32, i32
  }
  func.func @transform_3(%arg0: i32) -> (i32, i32) {
    %c0_i32 = arith.constant 0 : i32
    %c0_i32_0 = arith.constant 0 : i32
    return %arg0, %c0_i32 : i32, i32
  }
}

</mosaic_0001>

<bundles_post_ra>
// kernel: tpu_custom_call.1
= control target key start
LH: loop header
LB: loop body
LE: loop exit
PB: predicated region body
PF: predicated region fallthrough
CT: control target
= control target key end

     0   :  { %8 = vsyncpa [#allocation3], 0  ;;  %s220_s0 = inlined_call_operand.hbm [shape: f32[16,32], index: 0, kind: input, shape index: {}]   ;;  %s221_s1 = inlined_call_operand.vmem [shape: f32[1,32], index: 1, kind: input, shape index: {}]   ;;  %s222_s2 = inlined_call_operand.vmem [shape: f32[1,32], index: 2, kind: input, shape index: {}]   ;;  %s223_s3 = inlined_call_operand.hbm [shape: f32[16,32], index: 3, kind: output, shape index: {}]  }
   0x1   :  { %9 = vsyncpa [#allocation4], 0  ;;  %s154_s12 = smov [#allocation2]   ;;  %s106_s16 = scalar_lea.hbm %s220_s0, 256 }
   0x2   :  { %s15_s13 = sshll.u32 %s154_s12, 4  ;;  %p107_p0 = scmp.ne.s32.totalorder %s220_s0, %s106_s16  ;;  %s16_s13 = int_to_ptr.vmem [resolvable:$true] %s15_s13 }
   0x3   :  { %p110_p1 = scmp.lt.u32.totalorder %s106_s16, %s220_s0 }
   0x5   :  { %p112_p2 = pnand %p110_p1, %p107_p0 }
   0x7   :  { %115 = shalt.err (!%p112_p2)
}
   0x8   :  { %s116_s21 = scalar_lea.vmem %s16_s13, 256  ;;  %p121_p4 = scmp.lt.s32.totalorder %s16_s13, %s16_s13 }
   0x9   :  { %p117_p3 = scmp.ne.s32.totalorder %s16_s13, %s116_s21  ;;  %p122_p5 = scmp.lt.s32.totalorder %s116_s21, %s116_s21 }
   0xb   :  { %p123_p6 = por %p122_p5, %p121_p4 }
   0xd   :  { %p124_p7 = pnand %p123_p6, %p117_p3 }
   0xf   :  { %127 = shalt.err (!%p124_p7)
}
  0x10   :  { %s155_s22 = smov 128   ;;  %s156_s23 = smov 8  }
  0x11   :  { %21 = dma.hbm_to_vmem [thread:$0]  %s220_s0, 256, %s16_s13, [#allocation3], %s155_s22, %s155_s22, %s156_s23  }
  0x12   :  { %150 = dma.done.wait [#allocation3], 256  }
  0x13   :  { %151 = vsyncadd [#allocation3], 4294967040  ;;  %vm31_vm0 = vcmask 261120   ;;  %v29_v0 = vld [vmem:[#allocation2] sm:$0xff]  ;;  %v30_v1 = vld [vmem:[#allocation2 + $0x8] sm:$0xff]  ;;  %s157_s29 = smov [#allocation5]  }
  0x14   :  { %v32_v2 = vsel %vm31_vm0, %v29_v0, 0.0  ;;  %v35_v3 = vsel %vm31_vm0, %v30_v1, 0.0  ;;  %v96_v21 = vld [vmem:[%s221_s1] ss:$0 sm:$0xff]  ;;  %s84_s30 = sshll.u32 %s157_s29, 4  ;;  %s85_s30 = int_to_ptr.vmem [resolvable:$true] %s84_s30 }
  0x15   :  { %33 = vadd.xlane.f32.xlu0 %v32_v2  ;;  %v97_v23 = vld [vmem:[%s222_s2] ss:$0 sm:$0xff]  ;;  %s128_s4 = scalar_lea.vmem %s85_s30, 256  ;;  %p133_p9 = scmp.lt.s32.totalorder %s85_s30, %s85_s30 }
  0x16   :  { %p129_p8 = scmp.ne.s32.totalorder %s85_s30, %s128_s4  ;;  %p134_p10 = scmp.lt.s32.totalorder %s128_s4, %s128_s4 }
  0x18   :  { %p135_p11 = por %p134_p10, %p133_p9 }
  0x19   :  { %36 = vadd.xlane.f32.xlu0 %v35_v3 }
  0x1a   :  { %p136_p12 = pnand %p135_p11, %p129_p8 }
  0xa2   :  { %v34_v4 = vpop.xlane.xlu0 %33 }
  0xa3   :  { %v39_v5 = vmul.f32 0.03125, %v34_v4 }
  0xa5   :  { %v41_v6 = vsub.f32 %v29_v0, %v39_v5 }
  0xa6   :  { %v37_v7 = vpop.xlane.xlu0 %36 }
  0xa7   :  { %v40_v8 = vmul.f32 0.03125, %v37_v7  ;;  %v43_v9 = vmul.f32 %v41_v6, %v41_v6 }
  0xa9   :  { %v42_v10 = vsub.f32 %v30_v1, %v40_v8  ;;  %v45_v11 = vsel %vm31_vm0, %v43_v9, 0.0 }
  0xaa   :  { %46 = vadd.xlane.f32.xlu1 %v45_v11 }
  0xab   :  { %v44_v12 = vmul.f32 %v42_v10, %v42_v10 }
  0xad   :  { %v48_v13 = vsel %vm31_vm0, %v44_v12, 0.0 }
  0xae   :  { %49 = vadd.xlane.f32.xlu1 %v48_v13 }
 0x137   :  { %v47_v14 = vpop.xlane.xlu1 %46 }
 0x138   :  { %v51_v15 = vmul.f32 0.03125, %v47_v14 }
 0x13a   :  { %v53_v16 = vadd.f32 1e-05, %v51_v15 }
 0x13b   :  { %v50_v17 = vpop.xlane.xlu1 %49 }
 0x13c   :  { %102 = vrsqrt.f32 %v53_v16  ;;  %v52_v18 = vmul.f32 0.03125, %v50_v17 }
 0x13e   :  { %v54_v19 = vadd.f32 1e-05, %v52_v18 }
 0x140   :  { %104 = vrsqrt.f32 %v54_v19 }
 0x146   :  { %v103_v20 = vpop.eup %102 }
 0x147   :  { %v57_v22 = vmul.f32 %v103_v20, %v41_v6 }
 0x149   :  { %v66_v24 = vmul.f32 %v96_v21, %v57_v22 }
 0x14a   :  { %v105_v25 = vpop.eup %104 }
 0x14b   :  { %v58_v26 = vmul.f32 %v105_v25, %v42_v10  ;;  %v75_v27 = vadd.f32 %v97_v23, %v66_v24 }
 0x14d   :  { %v67_v28 = vmul.f32 %v96_v21, %v58_v26  ;;  %77 = vst.msk [vmem:[#allocation5] sm:$0xff] %vm31_vm0, %v75_v27 }
 0x14f   :  { %v76_v29 = vadd.f32 %v97_v23, %v67_v28 }
 0x151   :  { %78 = vst.msk [vmem:[#allocation5 + $0x8] sm:$0xff] %vm31_vm0, %v76_v29 }
 0x152   :  { %139 = shalt.err (!%p136_p12)
}
 0x153   :  { %s140_s5 = scalar_lea.hbm %s223_s3, 256 }
 0x154   :  { %p141_p13 = scmp.ne.s32.totalorder %s223_s3, %s140_s5  ;;  %p144_p0 = scmp.lt.u32.totalorder %s140_s5, %s223_s3 }
 0x156   :  { %p146_p1 = pnand %p144_p0, %p141_p13 }
 0x158   :  { %149 = shalt.err (!%p146_p1)
}
 0x159   :  { %90 = dma.vmem_to_hbm [thread:$0]  %s85_s30, 256, %s223_s3, [#allocation4], %s155_s22, %s155_s22, %s156_s23  }
 0x15a   :  { %152 = dma.done.wait [#allocation4], 256  }
 0x15b   :  { %153 = vsyncadd [#allocation4], 4294967040 }
 0x15c   :  { %94 = vsyncpa [#allocation3], 1 }
 0x15d   :  { %95 = vsyncpa [#allocation4], 1 }

</bundles_post_ra>
